<compile_context>
chip_gen: v7x
topology: tpu7x:2x2x1
jax: 0.10.0
libtpu: 0.0.40
codegen_flags: <defaults>
</compile_context>

<pallas_src>
import functools

import jax
import jax.numpy as jnp
from jax.experimental import pallas as pl
from jax.experimental.pallas import tpu as pltpu


def _ceil_div(a, b):
    return -(-a // b)


def _round_up(a, b):
    return _ceil_div(a, b) * b


def _conv2d_kernel(x_ref, w_ref, b_ref, o_ref, *, k, w_k, chunk_m, n_chunks):
    """One (batch, row-tile) grid step.

    x_ref: (1, 1, slab_M, K)    width-folded input slab incl. k-1 halo rows
    w_ref: (k, K, C_out_p)      per-dy weight matrices (K = k*C_in_p)
    b_ref: (1, C_out_p)         f32 bias row
    o_ref: (1, tile_M, C_out_p) tile_M = n_chunks * chunk_m
    """
    c_out_p = o_ref.shape[-1]
    ws = [w_ref[dy] for dy in range(k)]      # hoisted: loaded once per step
    bias = b_ref[...]                        # (1, C_out_p), f32

    for c in range(n_chunks):                # static unroll, static offsets
        m0 = c * chunk_m
        acc = jnp.zeros((chunk_m, c_out_p), jnp.float32)
        for dy in range(k):                  # clean dot-accumulate chain (MRB-friendly)
            lhs = x_ref[0, 0, m0 + dy * w_k: m0 + dy * w_k + chunk_m, :]
            acc = acc + jnp.dot(lhs, ws[dy], preferred_element_type=jnp.float32)
        acc = acc + bias                     # f32 bias add (VPU, v5e-safe)
        o_ref[0, m0:m0 + chunk_m, :] = acc.astype(o_ref.dtype)


def single_conv2d_block_nhwc(x_nhwc, weight, bias, *, compute_dtype=jnp.float32,
                             out_dtype=None, lane_multiple=None,
                             target_step_m=4096):
    """Conv2d(C_in, C_out, k, stride=1, padding=(k-1)//2) on NHWC input.

    x_nhwc: (N, H, W, C_in); weight: (C_out, C_in, k, k) torch layout;
    bias: (C_out,).  Returns (N, H_out, W_out, C_out) in `out_dtype`.
    """
    n, h, w, c_in = x_nhwc.shape
    c_out, c_in_w, k, k2 = weight.shape
    assert c_in_w == c_in and k == k2
    if out_dtype is None:
        out_dtype = compute_dtype
    p = (k - 1) // 2
    h_out = h + 2 * p - k + 1
    w_out = w + 2 * p - k + 1

    if lane_multiple is None:
        # v6e/v7x MXU is 256 lanes wide; only bump when C_out already exceeds
        # 128 so small C_out is not inflated.  (On v5e 128 is right anyway.)
        lane_multiple = 256 if c_out > 128 else 128
    c_out_p = _round_up(c_out, lane_multiple)   # lane-dense unmasked stores
    c_in_p = _round_up(c_in, 8)                 # sublane-aligned channels
    w_k = _round_up(w_out, 8)                   # width multiple of 8
    kc = k * c_in_p                             # folded contraction depth

    # --- M tiling: vreg-resident chunk, ~target_step_m matmul rows per step.
    max_chunk_m = max(8, (64 * 1024) // (4 * c_out_p))       # <=64 KiB f32 acc
    chunk_rows = max(1, min(h_out, max_chunk_m // w_k))
    chunk_m = chunk_rows * w_k
    n_chunks = max(1, min(_ceil_div(h_out, chunk_rows),
                          _ceil_div(target_step_m, chunk_m)))
    row_tile = chunk_rows * n_chunks
    h_pad = _round_up(h_out, row_tile)
    n_tiles = h_pad // row_tile
    tile_m = row_tile * w_k
    slab_rows = row_tile + k - 1
    slab_m = slab_rows * w_k

    # --- wrapper-side packing (layout plumbing, all plain XLA) -------------
    x = x_nhwc.astype(compute_dtype)
    x = jnp.pad(x, ((0, 0),
                    (p, h_pad + k - 1 - p - h),
                    (p, w_k + k - 1 - p - w),
                    (0, c_in_p - c_in)))
    # width-only im2col: (N, h_pad+k-1, w_k, k*c_in_p), channel idx = dx*c_in_p+c
    x = jnp.concatenate([x[:, :, dx:dx + w_k, :] for dx in range(k)], axis=-1)
    # overlapping row slabs (halo rows materialised), flattened (row,width) -> M
    row_idx = (jnp.arange(n_tiles)[:, None] * row_tile
               + jnp.arange(slab_rows)[None, :])
    slabs = x[:, row_idx].reshape(n, n_tiles, slab_m, kc)

    # weight -> (k, k*c_in_p, c_out_p) matching the packed channel order
    w_mat = jnp.transpose(weight, (2, 3, 1, 0)).astype(compute_dtype)
    w_mat = jnp.pad(w_mat, ((0, 0), (0, 0),
                            (0, c_in_p - c_in), (0, c_out_p - c_out)))
    w_mat = w_mat.reshape(k, kc, c_out_p)
    b_mat = jnp.pad(bias.astype(jnp.float32),
                    (0, c_out_p - c_out)).reshape(1, c_out_p)

    # --- VMEM budget: double-buffered blocks + acc, clamped to chip VMEM ---
    cb = jnp.dtype(compute_dtype).itemsize
    ob = jnp.dtype(out_dtype).itemsize
    est = (2 * slab_m * kc * cb
           + 2 * tile_m * c_out_p * ob
           + 2 * k * kc * c_out_p * cb
           + 2 * c_out_p * 4
           + chunk_m * c_out_p * 4)
    try:
        cap = getattr(pltpu.get_tpu_info(), "vmem_capacity_bytes",
                      64 * 1024 * 1024)
    except Exception:
        cap = 64 * 1024 * 1024
    vmem_limit = int(min(max(2 * est, 32 * 1024 * 1024), int(0.9 * cap)))

    out = pl.pallas_call(
        functools.partial(_conv2d_kernel, k=k, w_k=w_k,
                          chunk_m=chunk_m, n_chunks=n_chunks),
        out_shape=jax.ShapeDtypeStruct((n, h_pad * w_k, c_out_p), out_dtype),
        grid_spec=pltpu.PrefetchScalarGridSpec(
            num_scalar_prefetch=0,
            grid=(n, n_tiles),
            in_specs=[
                # per-step input slab (with halo) -> VMEM independent of image size
                pl.BlockSpec((1, 1, slab_m, kc), lambda b, i: (b, i, 0, 0)),
                # constant weight / bias blocks (fetched once)
                pl.BlockSpec((k, kc, c_out_p), lambda b, i: (0, 0, 0)),
                pl.BlockSpec((1, c_out_p), lambda b, i: (0, 0)),
            ],
            out_specs=pl.BlockSpec((1, tile_m, c_out_p), lambda b, i: (b, i, 0)),
        ),
        compiler_params=pltpu.CompilerParams(
            dimension_semantics=("parallel", "parallel"),
            vmem_limit_bytes=vmem_limit,
        ),
    )(slabs, w_mat, b_mat)

    # drop alignment padding (callers that tolerate padded NHWC can skip this)
    out = out.reshape(n, h_pad, w_k, c_out_p)[:, :h_out, :w_out, :c_out]
    return out


def single_conv2d_block(x_nchw, weight, bias, **kwargs):
    """PyTorch-layout entry: (N, C_in, H, W) -> (N, C_out, H_out, W_out)."""
    x_nhwc = jnp.transpose(x_nchw, (0, 2, 3, 1))
    out = single_conv2d_block_nhwc(x_nhwc, weight, bias, **kwargs)
    return jnp.transpose(out, (0, 3, 1, 2))


def _reference(x_nchw, weight, bias):
    p = (weight.shape[-1] - 1) // 2
    y = jax.lax.conv_general_dilated(
        x_nchw, weight, window_strides=(1, 1),
        padding=[(p, p), (p, p)],
        dimension_numbers=("NCHW", "OIHW", "NCHW"),
        precision=jax.lax.Precision.HIGHEST)
    return y + bias.reshape(1, -1, 1, 1)


if __name__ == "__main__":
    key = jax.random.PRNGKey(0)
    k_x, k_w, k_b = jax.random.split(key, 3)

    n, c_in, c_out, h, w, ksize = 2, 4, 8, 16, 16, 3
    x = jax.random.normal(k_x, (n, c_in, h, w), dtype=jnp.float32)
    weight = jax.random.normal(k_w, (c_out, c_in, ksize, ksize),
                               dtype=jnp.float32) * 0.1
    bias = jax.random.normal(k_b, (c_out,), dtype=jnp.float32) * 0.1

    ref = _reference(x, weight, bias)

    # f32 compute path (exact-precision check)
    out = jax.block_until_ready(single_conv2d_block(x, weight, bias))
    assert out.shape == (n, c_out, h, w), out.shape
    assert jnp.allclose(out, ref, atol=1e-3, rtol=1e-3), "f32 mismatch vs reference"

    # bf16 compute + bf16 writeback (bandwidth path; f32 MXU accumulation)
    out_bf16 = jax.block_until_ready(
        single_conv2d_block(x, weight, bias,
                            compute_dtype=jnp.bfloat16,
                            out_dtype=jnp.bfloat16))
    assert out_bf16.dtype == jnp.bfloat16
    assert jnp.allclose(out_bf16.astype(jnp.float32), ref,
                        atol=5e-2, rtol=5e-2), "bf16 mismatch vs reference"

    # odd shapes / k=5: exercises padding, halo and crop paths
    n2, c_in2, c_out2, h2, w2, k2 = 1, 3, 5, 13, 10, 5
    x2 = jax.random.normal(k_x, (n2, c_in2, h2, w2), dtype=jnp.float32)
    w2_ = jax.random.normal(k_w, (c_out2, c_in2, k2, k2), dtype=jnp.float32) * 0.1
    b2_ = jax.random.normal(k_b, (c_out2,), dtype=jnp.float32) * 0.1
    out2 = jax.block_until_ready(single_conv2d_block(x2, w2_, b2_))
    ref2 = _reference(x2, w2_, b2_)
    assert out2.shape == ref2.shape, (out2.shape, ref2.shape)
    assert jnp.allclose(out2, ref2, atol=1e-3, rtol=1e-3), "k=5 mismatch vs reference"

    print("KERNEL_OK")
</pallas_src>

<mosaic_0001>
module attributes {stable_mosaic.version = 11 : i64} {
  func.func @_conv2d_kernel(%arg0: i32, %arg1: i32, %arg2: memref<1x1x288x24xf32, #tpu.memory_space<vmem>>, %arg3: memref<3x24x128xf32, #tpu.memory_space<vmem>>, %arg4: memref<1x128xf32, #tpu.memory_space<vmem>>, %arg5: memref<1x256x128xf32, #tpu.memory_space<vmem>>) attributes {dimension_semantics = [#tpu.dimension_semantics<parallel>, #tpu.dimension_semantics<parallel>], iteration_bounds = array<i64: 2, 1>, scalar_prefetch = 0 : i64, scratch_operands = 0 : i64, tpu.core_type = #tpu.core_type<tc>, window_params = [{transform_indices = @transform_0, window_bounds = array<i64: 1, 1, 288, 24>}, {pipeline_mode = #tpu.pipeline_mode<synchronous>, transform_indices = @transform_1, window_bounds = array<i64: 3, 24, 128>}, {pipeline_mode = #tpu.pipeline_mode<synchronous>, transform_indices = @transform_2, window_bounds = array<i64: 1, 128>}, {transform_indices = @transform_3, window_bounds = array<i64: 1, 256, 128>}]} {
    %c0 = arith.constant 0 : index
    %c0_0 = arith.constant 0 : index
    %c0_1 = arith.constant 0 : index
    %0 = vector.load %arg3[%c0, %c0_0, %c0_1] : memref<3x24x128xf32, #tpu.memory_space<vmem>>, vector<1x24x128xf32>
    %1 = vector.shape_cast %0 : vector<1x24x128xf32> to vector<24x128xf32>
    %c1 = arith.constant 1 : index
    %c0_2 = arith.constant 0 : index
    %c0_3 = arith.constant 0 : index
    %2 = vector.load %arg3[%c1, %c0_2, %c0_3] : memref<3x24x128xf32, #tpu.memory_space<vmem>>, vector<1x24x128xf32>
    %3 = vector.shape_cast %2 : vector<1x24x128xf32> to vector<24x128xf32>
    %c2 = arith.constant 2 : index
    %c0_4 = arith.constant 0 : index
    %c0_5 = arith.constant 0 : index
    %4 = vector.load %arg3[%c2, %c0_4, %c0_5] : memref<3x24x128xf32, #tpu.memory_space<vmem>>, vector<1x24x128xf32>
    %5 = vector.shape_cast %4 : vector<1x24x128xf32> to vector<24x128xf32>
    %c0_6 = arith.constant 0 : index
    %c0_7 = arith.constant 0 : index
    %6 = vector.load %arg4[%c0_6, %c0_7] : memref<1x128xf32, #tpu.memory_space<vmem>>, vector<1x128xf32>
    %cst = arith.constant 0.000000e+00 : f32
    %7 = vector.broadcast %cst : f32 to vector<128x128xf32>
    %c0_8 = arith.constant 0 : index
    %c0_9 = arith.constant 0 : index
    %c0_10 = arith.constant 0 : index
    %c0_11 = arith.constant 0 : index
    %8 = vector.load %arg2[%c0_8, %c0_9, %c0_10, %c0_11] : memref<1x1x288x24xf32, #tpu.memory_space<vmem>>, vector<1x1x128x24xf32>
    %9 = vector.shape_cast %8 : vector<1x1x128x24xf32> to vector<128x24xf32>
    %cst_12 = arith.constant dense<0.000000e+00> : vector<128x128xf32>
    %10 = tpu.matmul %9, %1, %cst_12 {dimension_numbers = #tpu.dot_dimension_numbers<[1], [0], [0], [1], [0, 0, 1, 1], [], []>} : vector<128x24xf32>, vector<24x128xf32>, vector<128x128xf32> -> vector<128x128xf32>
    %11 = arith.addf %7, %10 : vector<128x128xf32>
    %c0_13 = arith.constant 0 : index
    %c0_14 = arith.constant 0 : index
    %c16 = arith.constant 16 : index
    %c0_15 = arith.constant 0 : index
    %12 = vector.load %arg2[%c0_13, %c0_14, %c16, %c0_15] : memref<1x1x288x24xf32, #tpu.memory_space<vmem>>, vector<1x1x128x24xf32>
    %13 = vector.shape_cast %12 : vector<1x1x128x24xf32> to vector<128x24xf32>
    %cst_16 = arith.constant dense<0.000000e+00> : vector<128x128xf32>
    %14 = tpu.matmul %13, %3, %cst_16 {dimension_numbers = #tpu.dot_dimension_numbers<[1], [0], [0], [1], [0, 0, 1, 1], [], []>} : vector<128x24xf32>, vector<24x128xf32>, vector<128x128xf32> -> vector<128x128xf32>
    %15 = arith.addf %11, %14 : vector<128x128xf32>
    %c0_17 = arith.constant 0 : index
    %c0_18 = arith.constant 0 : index
    %c32 = arith.constant 32 : index
    %c0_19 = arith.constant 0 : index
    %16 = vector.load %arg2[%c0_17, %c0_18, %c32, %c0_19] : memref<1x1x288x24xf32, #tpu.memory_space<vmem>>, vector<1x1x128x24xf32>
    %17 = vector.shape_cast %16 : vector<1x1x128x24xf32> to vector<128x24xf32>
    %cst_20 = arith.constant dense<0.000000e+00> : vector<128x128xf32>
    %18 = tpu.matmul %17, %5, %cst_20 {dimension_numbers = #tpu.dot_dimension_numbers<[1], [0], [0], [1], [0, 0, 1, 1], [], []>} : vector<128x24xf32>, vector<24x128xf32>, vector<128x128xf32> -> vector<128x128xf32>
    %19 = arith.addf %15, %18 : vector<128x128xf32>
    %20 = vector.broadcast %6 : vector<1x128xf32> to vector<128x128xf32>
    %21 = arith.addf %19, %20 : vector<128x128xf32>
    %c0_21 = arith.constant 0 : index
    %c0_22 = arith.constant 0 : index
    %c0_23 = arith.constant 0 : index
    %22 = vector.load %arg5[%c0_21, %c0_22, %c0_23] : memref<1x256x128xf32, #tpu.memory_space<vmem>>, vector<1x128x128xf32>
    %23 = vector.shape_cast %22 : vector<1x128x128xf32> to vector<128x128xf32>
    %24 = vector.shape_cast %21 : vector<128x128xf32> to vector<1x128x128xf32>
    tpu.vector_store %arg5[%c0_21, %c0_22, %c0_23], %24 {strides = array<i32>} : memref<1x256x128xf32, #tpu.memory_space<vmem>>, vector<1x128x128xf32>,
    %cst_24 = arith.constant 0.000000e+00 : f32
    %25 = vector.broadcast %cst_24 : f32 to vector<128x128xf32>
    %c0_25 = arith.constant 0 : index
    %c0_26 = arith.constant 0 : index
    %c128 = arith.constant 128 : index
    %c0_27 = arith.constant 0 : index
    %26 = vector.load %arg2[%c0_25, %c0_26, %c128, %c0_27] : memref<1x1x288x24xf32, #tpu.memory_space<vmem>>, vector<1x1x128x24xf32>
    %27 = vector.shape_cast %26 : vector<1x1x128x24xf32> to vector<128x24xf32>
    %cst_28 = arith.constant dense<0.000000e+00> : vector<128x128xf32>
    %28 = tpu.matmul %27, %1, %cst_28 {dimension_numbers = #tpu.dot_dimension_numbers<[1], [0], [0], [1], [0, 0, 1, 1], [], []>} : vector<128x24xf32>, vector<24x128xf32>, vector<128x128xf32> -> vector<128x128xf32>
    %29 = arith.addf %25, %28 : vector<128x128xf32>
    %c0_29 = arith.constant 0 : index
    %c0_30 = arith.constant 0 : index
    %c144 = arith.constant 144 : index
    %c0_31 = arith.constant 0 : index
    %30 = vector.load %arg2[%c0_29, %c0_30, %c144, %c0_31] : memref<1x1x288x24xf32, #tpu.memory_space<vmem>>, vector<1x1x128x24xf32>
    %31 = vector.shape_cast %30 : vector<1x1x128x24xf32> to vector<128x24xf32>
    %cst_32 = arith.constant dense<0.000000e+00> : vector<128x128xf32>
    %32 = tpu.matmul %31, %3, %cst_32 {dimension_numbers = #tpu.dot_dimension_numbers<[1], [0], [0], [1], [0, 0, 1, 1], [], []>} : vector<128x24xf32>, vector<24x128xf32>, vector<128x128xf32> -> vector<128x128xf32>
    %33 = arith.addf %29, %32 : vector<128x128xf32>
    %c0_33 = arith.constant 0 : index
    %c0_34 = arith.constant 0 : index
    %c160 = arith.constant 160 : index
    %c0_35 = arith.constant 0 : index
    %34 = vector.load %arg2[%c0_33, %c0_34, %c160, %c0_35] : memref<1x1x288x24xf32, #tpu.memory_space<vmem>>, vector<1x1x128x24xf32>
    %35 = vector.shape_cast %34 : vector<1x1x128x24xf32> to vector<128x24xf32>
    %cst_36 = arith.constant dense<0.000000e+00> : vector<128x128xf32>
    %36 = tpu.matmul %35, %5, %cst_36 {dimension_numbers = #tpu.dot_dimension_numbers<[1], [0], [0], [1], [0, 0, 1, 1], [], []>} : vector<128x24xf32>, vector<24x128xf32>, vector<128x128xf32> -> vector<128x128xf32>
    %37 = arith.addf %33, %36 : vector<128x128xf32>
    %38 = vector.broadcast %6 : vector<1x128xf32> to vector<128x128xf32>
    %39 = arith.addf %37, %38 : vector<128x128xf32>
    %c0_37 = arith.constant 0 : index
    %c128_38 = arith.constant 128 : index
    %c0_39 = arith.constant 0 : index
    %40 = vector.load %arg5[%c0_37, %c128_38, %c0_39] : memref<1x256x128xf32, #tpu.memory_space<vmem>>, vector<1x128x128xf32>
    %41 = vector.shape_cast %40 : vector<1x128x128xf32> to vector<128x128xf32>
    %42 = vector.shape_cast %39 : vector<128x128xf32> to vector<1x128x128xf32>
    tpu.vector_store %arg5[%c0_37, %c128_38, %c0_39], %42 {strides = array<i32>} : memref<1x256x128xf32, #tpu.memory_space<vmem>>, vector<1x128x128xf32>,
    return
  }
  func.func @transform_0(%arg0: i32, %arg1: i32) -> (i32, i32, i32, i32) {
    %c0_i32 = arith.constant 0 : i32
    %c0_i32_0 = arith.constant 0 : i32
    %c0_i32_1 = arith.constant 0 : i32
    return %arg0, %arg1, %c0_i32, %c0_i32_0 : i32, i32, i32, i32
  }
  func.func @transform_1(%arg0: i32, %arg1: i32) -> (i32, i32, i32) {
    %c0_i32 = arith.constant 0 : i32
    %c0_i32_0 = arith.constant 0 : i32
    %c0_i32_1 = arith.constant 0 : i32
    %c0_i32_2 = arith.constant 0 : i32
    return %c0_i32, %c0_i32_0, %c0_i32_1 : i32, i32, i32
  }
  func.func @transform_2(%arg0: i32, %arg1: i32) -> (i32, i32) {
    %c0_i32 = arith.constant 0 : i32
    %c0_i32_0 = arith.constant 0 : i32
    %c0_i32_1 = arith.constant 0 : i32
    return %c0_i32, %c0_i32_0 : i32, i32
  }
  func.func @transform_3(%arg0: i32, %arg1: i32) -> (i32, i32, i32) {
    %c0_i32 = arith.constant 0 : i32
    %c0_i32_0 = arith.constant 0 : i32
    return %arg0, %arg1, %c0_i32 : i32, i32, i32
  }
}

</mosaic_0001>

<bundles_post_ra>
// kernel: tpu_custom_call.1
= control target key start
LH: loop header
LB: loop body
LE: loop exit
PB: predicated region body
PF: predicated region fallthrough
CT: control target
= control target key end

     0   :  { %8 = vsyncpa [#allocation3], 0  ;;  %s2720_s0 = inlined_call_operand.vmem [shape: f32[2,1,288,24], index: 0, kind: input, shape index: {}]   ;;  %s2721_s1 = inlined_call_operand.vmem [shape: f32[3,24,128], index: 1, kind: input, shape index: {}]   ;;  %s2722_s2 = inlined_call_operand.vmem [shape: f32[1,128], index: 2, kind: input, shape index: {}]   ;;  %s2723_s3 = inlined_call_operand.hbm [shape: f32[2,256,128], index: 3, kind: output, shape index: {}]  }
   0x1   :  { %10 = vsyncpa [#allocation3 + $0x1], 0  ;;  %s2212_s12 = smov 0   ;;  %s2214_s13 = smov 0  }
   0x2   :  { %s2216_s14 = smov 0   ;;  %s2218_s15 = smov 0  }
   0x3   :  { %s2220_s16 = smov 0   ;;  %s2222_s17 = smov 0  }
   0x4 LB: > { %s1553_s18 = sadd.s32 4294967295, %s2187_s17   ;;  %s1554_s19 = sadd.s32 4294967294, %s2187_s17   ;;  %s2187_s17 = sphi %s2222_s17, %s16_s17   ;;  %s2183_s16 = sphi %s2220_s16, %s2730_s16   ;;  %s2179_s15 = sphi %s2218_s15, %s2729_s15   ;;  %s2175_s14 = sphi %s2216_s14, %s2728_s14   ;;  %s2171_s13 = sphi %s2214_s13, %s2727_s13   ;;  %s2167_s12 = sphi %s2212_s12, %s2726_s12  }
   0x5   : > { %s28_s20 = sadd.s32 1, %s2183_s16  ;;  %s107_s21 = sadd.s32 1, %s2175_s14 }
   0x6   : > { %p30_p0 = scmp.ge.s32.totalorder %s28_s20, 2  ;;  %p117_p1 = scmp.ne.s32.totalorder %s2175_s14, %s2171_s13 }
   0x7   : > { %p118_p2 = scmp.eq.s32.totalorder %s1553_s18, 1  ;;  %p123_p3 = scmp.ne.s32.totalorder %s2171_s13, %s2167_s12 }
   0x8   : > { %s2732_s20 = smov (%p30_p0, %s28_s20), 0  ;;  %p124_p5 = scmp.eq.s32.totalorder %s1554_s19, 1 }
   0x9   : > { %p2252_p4 = por %p118_p2, %p117_p1  ;;  %s102_s23 = ssub.s32 %s2183_s16, %s2732_s20 }
   0xa   : > { %p1557_p6 = scmp.ge.s32.totalorder %s2187_s17, 1  ;;  %p105_p7 = scmp.eq.s32.totalorder %s102_s23, 0 }
   0xb   : > { %p2259_p8 = por %p124_p5, %p123_p3  ;;  %p160_p9 = scmp.lt.s32.totalorder %s2187_s17, 3 }
   0xc   : > { %s2265_s25 = scalar_select %p105_p7, %s2175_s14, %s107_s21  }
   0xd   : > { %p161_p10 = pnand %p1557_p6, %p160_p9 }
   0xe   : > { %v1560_v0 = vld [vmem:[%s2721_s1 + $0x18] sm:$0xff] (!%p161_p10)  ;;  %v1561_v1 = vld [vmem:[%s2721_s1 + $0x20] sm:$0xff] (!%p161_p10)  ;;  %p188_p11 = scmp.lt.s32.totalorder (!%p161_p10), %s2179_s15, 1  ;;  %v1562_v3 = vld [vmem:[%s2721_s1 + $0x28] sm:$0xff] (!%p161_p10)  ;;  %vm228_vm0 = vcmask (!%p161_p10), 195584   ;;  %s2189_s26 = smov (!%p161_p10), [#allocation2]  }
   0xf   : > { %164 = sbr.rel (%p161_p10) target bundleno = 352 (0x160), region = 32  ;;  %v1963_v2 = vpack.c.bf16 (!%p161_p10), %v1561_v1, %v1560_v0  ;;  %v198_v4 = vld [vmem:[%s2721_s1] sm:$0xff] (!%p161_p10)  ;;  %v199_v5 = vld [vmem:[%s2721_s1 + $0x8] sm:$0xff] (!%p161_p10)  ;;  %v200_v13 = vld [vmem:[%s2721_s1 + $0x10] sm:$0xff] (!%p161_p10)  ;;  %s2113_s27 = sshll.u32 (!%p161_p10), %s2189_s26, 4  ;;  %s2114_s27 = int_to_ptr.vmem [resolvable:$false] %s2113_s27 }
  0x10   : > { %v1967_v6 = vpack.c.bf16 (!%p161_p10), %v199_v5, %v198_v4  ;;  %v1563_v15 = vld [vmem:[%s2721_s1 + $0x30] sm:$0xff] (!%p161_p10)  ;;  %v1564_v16 = vld [vmem:[%s2721_s1 + $0x38] sm:$0xff] (!%p161_p10)  ;;  %v1565_v45 = vld [vmem:[%s2721_s1 + $0x40] sm:$0xff] (!%p161_p10)  ;;  %s2115_s28 = scalar_lea.vmem (!%p161_p10), %s2114_s27, 8192 }
  0x11   : > { %1964 = vmatprep.subr.bf16.mxu0 (!%p161_p10), %v1963_v2  ;;  %1976 = vmatprep.subr.bf16.mxu1 (!%p161_p10), %v1963_v2  ;;  %v1971_v20 = vpack.c.bf16 (!%p161_p10), %v1564_v16, %v1563_v15  ;;  %v2595_v48 = vld [vmem:[%s2722_s2] ss:$0 sm:$0xff] (!%p161_p10) }
  0x12   : > { %1966 = vmatpush3.bf16.msra.mxu0 (!%p161_p10), %v1963_v2  ;;  %1978 = vmatpush3.bf16.msra.mxu1 (!%p161_p10), %v1963_v2 }
  0x13   : > { %1787 = vmatprep.subr.mxu0 (!%p161_p10), %v1562_v3  ;;  %1877 = vmatprep.subr.mxu1 (!%p161_p10), %v1562_v3 }
  0x16   : > { %s189_s5 = scalar_select %p188_p11, %s2179_s15, 1  ;;  %1788 = vmatpush3.msra.mxu0 %v1562_v3  ;;  %1878 = vmatpush3.msra.mxu1 %v1562_v3 }
  0x17   : > { %1968 = vmatprep.subr.bf16.mxu0 %v1967_v6  ;;  %1980 = vmatprep.subr.bf16.mxu1 %v1967_v6 }
  0x18   : > { %s2051_s10 = smul.u32 288, %s189_s5  ;;  %s185_s5 = sand.u32 1, %s2171_s13  }
  0x19   : > { %s1558_s6 = sshll.u32 %s185_s5, 8  ;;  %s2674_s21 = scalar_lea.sflag [#allocation3], %s185_s5 }
  0x1a   : > { %s2287_s19 = scalar_lea.vmem %s2720_s0, %s2051_s10  ;;  %s2600_s9 = scalar_lea.vmem [#allocation2], %s1558_s6 }
  0x1b   : > { %v2290_v7 = vld [vmem:[%s2287_s19 + $0x10] sm:$0xff]  ;;  %v2296_v9 = vld [vmem:[%s2287_s19 + $0x18] sm:$0xff]  ;;  %v2308_v11 = vld [vmem:[%s2287_s19 + $0x20] sm:$0xff]  ;;  %s1668_s10 = sshll.u32 %s2179_s15, 12  ;;  %s1471_s11 = sshll.u32 %s2600_s9, 4  ;;  %s2665_s11 = int_to_ptr.vmem [resolvable:$true] %s1471_s11 }
  0x1c   : > { %v2293_v8 = vld [vmem:[%s2287_s19 + $0x90] sm:$0xff]  ;;  %1789 = vmatprep.mubr.msk.f32.mxu0 %vm228_vm0, %v2290_v7  ;;  %v2301_v10 = vld [vmem:[%s2287_s19 + $0x98] sm:$0xff]  ;;  %v2311_v12 = vld [vmem:[%s2287_s19 + $0xa0] sm:$0xff]  ;;  %s2109_s23 = scalar_lea.vmem %s2665_s11, 4096  ;;  %p2116_p1 = scmp.lt.s32.totalorder %s2665_s11, %s2114_s27 }
  0x1d   : > { %1879 = vmatprep.mubr.msk.f32.mxu1 %vm228_vm0, %v2293_v8  ;;  %1790 = vmatmul.mubr.msk.f32.vlgmr.msra.gmra.mrb[0].mxu0 %vm228_vm0, %v2296_v9  ;;  %v2319_v14 = vld [vmem:[%s2287_s19 + $0x28] sm:$0xff]  ;;  %v2331_v18 = vld [vmem:[%s2287_s19 + $0x30] sm:$0xff]  ;;  %v2347_v21 = vld [vmem:[%s2287_s19 + $0x38] sm:$0xff]  ;;  %p2110_p12 = scmp.ne.s32.totalorder %s2665_s11, %s2109_s23  ;;  %p2117_p2 = scmp.lt.s32.totalorder %s2115_s28, %s2109_s23 }
  0x1e   : > { %1880 = vmatmul.mubr.msk.f32.vlgmr.msra.gmra.mrb[0].mxu1 %vm228_vm0, %v2301_v10  ;;  %1970 = vmatpush3.bf16.msra.mxu0 %v1967_v6  ;;  %v2328_v17 = vld [vmem:[%s2287_s19 + $0xa8] sm:$0xff]  ;;  %v2338_v19 = vld [vmem:[%s2287_s19 + $0xb0] sm:$0xff]  ;;  %v2352_v22 = vld [vmem:[%s2287_s19 + $0xb8] sm:$0xff] }
  0x1f   : > { %1982 = vmatpush3.bf16.msra.mxu1 %v1967_v6  ;;  %1792 = vmatprep.mubr.msk.f32.mxu0 %vm228_vm0, %v2308_v11  ;;  %v2355_v23 = vld [vmem:[%s2287_s19 + $0x40] sm:$0xff]  ;;  %v2367_v25 = vld [vmem:[%s2287_s19 + $0x48] sm:$0xff]  ;;  %v2375_v27 = vld [vmem:[%s2287_s19 + $0x50] sm:$0xff]  ;;  %p2111_p13 = pnand %p2110_p12, %p2252_p4  ;;  %p2118_p3 = por %p2117_p2, %p2116_p1 }
  0x20   : > { %1882 = vmatprep.mubr.msk.f32.mxu1 %vm228_vm0, %v2311_v12  ;;  %1817 = vmatprep.subr.mxu0 %v200_v13  ;;  %v2358_v24 = vld [vmem:[%s2287_s19 + $0xc0] sm:$0xff]  ;;  %v2372_v26 = vld [vmem:[%s2287_s19 + $0xc8] sm:$0xff]  ;;  %v2378_v28 = vld [vmem:[%s2287_s19 + $0xd0] sm:$0xff] }
  0x21   : > { %1793 = vmatmul.mubr.msk.f32.gmra.mrb[2].mxu0 %vm228_vm0, %v2319_v14  ;;  %1907 = vmatprep.subr.mxu1 %v200_v13  ;;  %v2387_v29 = vld [vmem:[%s2287_s19 + $0x58] sm:$0xff]  ;;  %v2395_v31 = vld [vmem:[%s2287_s19 + $0x60] sm:$0xff]  ;;  %v2407_v33 = vld [vmem:[%s2287_s19 + $0x68] sm:$0xff]  ;;  %p2112_p0 = pneg %p2111_p13 }
  0x22   : > { %1883 = vmatmul.mubr.msk.f32.gmra.mrb[2].mxu1 %vm228_vm0, %v2328_v17  ;;  %1795 = vmatprep.mubr.msk.f32.mxu0 %vm228_vm0, %v2331_v18  ;;  %v2392_v30 = vld [vmem:[%s2287_s19 + $0xd8] sm:$0xff]  ;;  %v2398_v32 = vld [vmem:[%s2287_s19 + $0xe0] sm:$0xff]  ;;  %v2412_v34 = vld [vmem:[%s2287_s19 + $0xe8] sm:$0xff] }
  0x23   : > { %1885 = vmatprep.mubr.msk.f32.mxu1 %vm228_vm0, %v2338_v19  ;;  %1818 = vmatpush3.msra.mxu0 %v200_v13  ;;  %v2415_v35 = vld [vmem:[%s2287_s19 + $0x70] sm:$0xff]  ;;  %v2427_v37 = vld [vmem:[%s2287_s19 + $0x78] sm:$0xff]  ;;  %v2435_v39 = vld [vmem:[%s2287_s19 + $0x80] sm:$0xff]  ;;  %p2119_p5 = pnand %p2118_p3, %p2112_p0 }
  0x24   : > { %1908 = vmatpush3.msra.mxu1 %v200_v13  ;;  %1972 = vmatprep.subr.bf16.mxu0 %v1971_v20  ;;  %v2418_v36 = vld [vmem:[%s2287_s19 + $0xf0] sm:$0xff]  ;;  %v2432_v38 = vld [vmem:[%s2287_s19 + $0xf8] sm:$0xff]  ;;  %v2438_v40 = vld [vmem:[%s2287_s19 + $0x100] sm:$0xff] }
  0x25   : > { %1796 = vmatmul.mubr.msk.f32.gmra.mrb[4].mxu0 %vm228_vm0, %v2347_v21  ;;  %1984 = vmatprep.subr.bf16.mxu1 %v1971_v20  ;;  %v2447_v41 = vld [vmem:[%s2287_s19 + $0x88] sm:$0xff]  ;;  %v210_v43 = vld [vmem:[%s2287_s19] sm:$0xff]  ;;  %v1212_v46 = vld [vmem:[%s2287_s19 + $0x110] sm:$0xff] }
  0x26   : > { %1886 = vmatmul.mubr.msk.f32.gmra.mrb[4].mxu1 %vm228_vm0, %v2352_v22  ;;  %1798 = vmatprep.mubr.msk.f32.mxu0 %vm228_vm0, %v2355_v23  ;;  %v2452_v42 = vld [vmem:[%s2287_s19 + $0x108] sm:$0xff]  ;;  %v1213_v47 = vld [vmem:[%s2287_s19 + $0x118] sm:$0xff] }
  0x27   : > { %1888 = vmatprep.mubr.msk.f32.mxu1 %vm228_vm0, %v2358_v24  ;;  %v211_v44 = vld [vmem:[%s2287_s19 + $0x8] sm:$0xff]  ;;  %s2663_s19 = scalar_lea.hbm %s2723_s3, %s1668_s10 }
  0x29   : > { %1799 = vmatmul.mubr.msk.f32.gmra.mrb[6].mxu0 %vm228_vm0, %v2367_v25 }
  0x2a   : > { %1889 = vmatmul.mubr.msk.f32.gmra.mrb[6].mxu1 %vm228_vm0, %v2372_v26  ;;  %1801 = vmatprep.mubr.msk.f32.mxu0 %vm228_vm0, %v2375_v27 }
  0x2b   : > { %1891 = vmatprep.mubr.msk.f32.mxu1 %vm228_vm0, %v2378_v28 }
  0x2d   : > { %1802 = vmatmul.mubr.msk.f32.gmra.mrb[8].mxu0 %vm228_vm0, %v2387_v29 }
  0x2e   : > { %1892 = vmatmul.mubr.msk.f32.gmra.mrb[8].mxu1 %vm228_vm0, %v2392_v30  ;;  %1804 = vmatprep.mubr.msk.f32.mxu0 %vm228_vm0, %v2395_v31 }
  0x2f   : > { %1894 = vmatprep.mubr.msk.f32.mxu1 %vm228_vm0, %v2398_v32 }
  0x31   : > { %1805 = vmatmul.mubr.msk.f32.gmra.mrb[10].mxu0 %vm228_vm0, %v2407_v33 }
  0x32   : > { %1895 = vmatmul.mubr.msk.f32.gmra.mrb[10].mxu1 %vm228_vm0, %v2412_v34  ;;  %1807 = vmatprep.mubr.msk.f32.mxu0 %vm228_vm0, %v2415_v35 }
  0x33   : > { %1897 = vmatprep.mubr.msk.f32.mxu1 %vm228_vm0, %v2418_v36 }
  0x35   : > { %1808 = vmatmul.mubr.msk.f32.gmra.mrb[12].mxu0 %vm228_vm0, %v2427_v37 }
  0x36   : > { %1898 = vmatmul.mubr.msk.f32.gmra.mrb[12].mxu1 %vm228_vm0, %v2432_v38  ;;  %1810 = vmatprep.mubr.msk.f32.mxu0 %vm228_vm0, %v2435_v39 }
  0x37   : > { %1900 = vmatprep.mubr.msk.f32.mxu1 %vm228_vm0, %v2438_v40 }
  0x39   : > { %1811 = vmatmul.mubr.msk.f32.gmra.mrb[14].mxu0 %vm228_vm0, %v2447_v41 }
  0x3a   : > { %1901 = vmatmul.mubr.msk.f32.gmra.mrb[14].mxu1 %vm228_vm0, %v2452_v42  ;;  %1819 = vmatprep.mubr.msk.f32.mxu0 %vm228_vm0, %v210_v43 }
  0x3b   : > { %1909 = vmatprep.mubr.msk.f32.mxu1 %vm228_vm0, %v2435_v39 }
  0x3d   : > { %1820 = vmatmul.mubr.msk.f32.vlgmr.msra.gmra.mrb[0].mxu0 %vm228_vm0, %v211_v44 }
  0x3e   : > { %1910 = vmatmul.mubr.msk.f32.vlgmr.msra.gmra.mrb[0].mxu1 %vm228_vm0, %v2447_v41  ;;  %1974 = vmatpush3.bf16.msra.mxu0 %v1971_v20 }
  0x3f   : > { %1986 = vmatpush3.bf16.msra.mxu1 %v1971_v20  ;;  %1822 = vmatprep.mubr.msk.f32.mxu0 %vm228_vm0, %v2290_v7 }
  0x40   : > { %1912 = vmatprep.mubr.msk.f32.mxu1 %vm228_vm0, %v2293_v8  ;;  %1847 = vmatprep.subr.mxu0 %v1565_v45 }
  0x41   : > { %1823 = vmatmul.mubr.msk.f32.gmra.mrb[2].mxu0 %vm228_vm0, %v2296_v9  ;;  %1937 = vmatprep.subr.mxu1 %v1565_v45 }
  0x42   : > { %1913 = vmatmul.mubr.msk.f32.gmra.mrb[2].mxu1 %vm228_vm0, %v2301_v10  ;;  %1825 = vmatprep.mubr.msk.f32.mxu0 %vm228_vm0, %v2308_v11 }
  0x43   : > { %1915 = vmatprep.mubr.msk.f32.mxu1 %vm228_vm0, %v2311_v12  ;;  %1848 = vmatpush3.msra.mxu0 %v1565_v45 }
  0x44   : > { %1938 = vmatpush3.msra.mxu1 %v1565_v45 }
  0x45   : > { %1826 = vmatmul.mubr.msk.f32.gmra.mrb[4].mxu0 %vm228_vm0, %v2319_v14 }
  0x46   : > { %1916 = vmatmul.mubr.msk.f32.gmra.mrb[4].mxu1 %vm228_vm0, %v2328_v17  ;;  %1828 = vmatprep.mubr.msk.f32.mxu0 %vm228_vm0, %v2331_v18 }
  0x47   : > { %1918 = vmatprep.mubr.msk.f32.mxu1 %vm228_vm0, %v2338_v19 }
  0x49   : > { %1829 = vmatmul.mubr.msk.f32.gmra.mrb[6].mxu0 %vm228_vm0, %v2347_v21 }
  0x4a   : > { %1919 = vmatmul.mubr.msk.f32.gmra.mrb[6].mxu1 %vm228_vm0, %v2352_v22  ;;  %1831 = vmatprep.mubr.msk.f32.mxu0 %vm228_vm0, %v2355_v23 }
  0x4b   : > { %1921 = vmatprep.mubr.msk.f32.mxu1 %vm228_vm0, %v2358_v24 }
  0x4d   : > { %1832 = vmatmul.mubr.msk.f32.gmra.mrb[8].mxu0 %vm228_vm0, %v2367_v25 }
  0x4e   : > { %1922 = vmatmul.mubr.msk.f32.gmra.mrb[8].mxu1 %vm228_vm0, %v2372_v26  ;;  %1834 = vmatprep.mubr.msk.f32.mxu0 %vm228_vm0, %v2375_v27 }
  0x4f   : > { %1924 = vmatprep.mubr.msk.f32.mxu1 %vm228_vm0, %v2378_v28 }
  0x51   : > { %1835 = vmatmul.mubr.msk.f32.gmra.mrb[10].mxu0 %vm228_vm0, %v2387_v29 }
  0x52   : > { %1925 = vmatmul.mubr.msk.f32.gmra.mrb[10].mxu1 %vm228_vm0, %v2392_v30  ;;  %1837 = vmatprep.mubr.msk.f32.mxu0 %vm228_vm0, %v2395_v31 }
  0x53   : > { %1927 = vmatprep.mubr.msk.f32.mxu1 %vm228_vm0, %v2398_v32 }
  0x55   : > { %1838 = vmatmul.mubr.msk.f32.gmra.mrb[12].mxu0 %vm228_vm0, %v2407_v33 }
  0x56   : > { %1928 = vmatmul.mubr.msk.f32.gmra.mrb[12].mxu1 %vm228_vm0, %v2412_v34  ;;  %1840 = vmatprep.mubr.msk.f32.mxu0 %vm228_vm0, %v2415_v35 }
  0x57   : > { %1930 = vmatprep.mubr.msk.f32.mxu1 %vm228_vm0, %v2418_v36 }
  0x59   : > { %1841 = vmatmul.mubr.msk.f32.gmra.mrb[14].mxu0 %vm228_vm0, %v2427_v37 }
  0x5a   : > { %1931 = vmatmul.mubr.msk.f32.gmra.mrb[14].mxu1 %vm228_vm0, %v2432_v38  ;;  %1849 = vmatprep.mubr.msk.f32.mxu0 %vm228_vm0, %v2308_v11 }
  0x5b   : > { %1939 = vmatprep.mubr.msk.f32.mxu1 %vm228_vm0, %v2311_v12 }
  0x5d   : > { %1850 = vmatmul.mubr.msk.f32.vlgmr.msra.gmra.mrb[0].mxu0 %vm228_vm0, %v2319_v14 }
  0x5e   : > { %1940 = vmatmul.mubr.msk.f32.vlgmr.msra.gmra.mrb[0].mxu1 %vm228_vm0, %v2328_v17  ;;  %1852 = vmatprep.mubr.msk.f32.mxu0 %vm228_vm0, %v2331_v18 }
  0x5f   : > { %1942 = vmatprep.mubr.msk.f32.mxu1 %vm228_vm0, %v2338_v19 }
  0x61   : > { %1853 = vmatmul.mubr.msk.f32.gmra.mrb[2].mxu0 %vm228_vm0, %v2347_v21 }
  0x62   : > { %1943 = vmatmul.mubr.msk.f32.gmra.mrb[2].mxu1 %vm228_vm0, %v2352_v22  ;;  %1855 = vmatprep.mubr.msk.f32.mxu0 %vm228_vm0, %v2355_v23 }
  0x63   : > { %1945 = vmatprep.mubr.msk.f32.mxu1 %vm228_vm0, %v2358_v24 }
  0x65   : > { %1856 = vmatmul.mubr.msk.f32.gmra.mrb[4].mxu0 %vm228_vm0, %v2367_v25 }
  0x66   : > { %1946 = vmatmul.mubr.msk.f32.gmra.mrb[4].mxu1 %vm228_vm0, %v2372_v26  ;;  %1858 = vmatprep.mubr.msk.f32.mxu0 %vm228_vm0, %v2375_v27 }
  0x67   : > { %1948 = vmatprep.mubr.msk.f32.mxu1 %vm228_vm0, %v2378_v28 }
  0x69   : > { %1859 = vmatmul.mubr.msk.f32.gmra.mrb[6].mxu0 %vm228_vm0, %v2387_v29 }
  0x6a   : > { %1949 = vmatmul.mubr.msk.f32.gmra.mrb[6].mxu1 %vm228_vm0, %v2392_v30  ;;  %1861 = vmatprep.mubr.msk.f32.mxu0 %vm228_vm0, %v2395_v31 }
  0x6b   : > { %1951 = vmatprep.mubr.msk.f32.mxu1 %vm228_vm0, %v2398_v32 }
  0x6d   : > { %1862 = vmatmul.mubr.msk.f32.gmra.mrb[8].mxu0 %vm228_vm0, %v2407_v33 }
  0x6e   : > { %1952 = vmatmul.mubr.msk.f32.gmra.mrb[8].mxu1 %vm228_vm0, %v2412_v34  ;;  %1864 = vmatprep.mubr.msk.f32.mxu0 %vm228_vm0, %v2415_v35 }
  0x6f   : > { %1954 = vmatprep.mubr.msk.f32.mxu1 %vm228_vm0, %v2418_v36 }
  0x71   : > { %1865 = vmatmul.mubr.msk.f32.gmra.mrb[10].mxu0 %vm228_vm0, %v2427_v37 }
  0x72   : > { %1955 = vmatmul.mubr.msk.f32.gmra.mrb[10].mxu1 %vm228_vm0, %v2432_v38  ;;  %1867 = vmatprep.mubr.msk.f32.mxu0 %vm228_vm0, %v2435_v39 }
  0x73   : > { %1957 = vmatprep.mubr.msk.f32.mxu1 %vm228_vm0, %v2438_v40 }
  0x75   : > { %1868 = vmatmul.mubr.msk.f32.gmra.mrb[12].mxu0 %vm228_vm0, %v2447_v41 }
  0x76   : > { %1958 = vmatmul.mubr.msk.f32.gmra.mrb[12].mxu1 %vm228_vm0, %v2452_v42  ;;  %1870 = vmatprep.mubr.msk.f32.mxu0 %vm228_vm0, %v2293_v8 }
  0x77   : > { %1960 = vmatprep.mubr.msk.f32.mxu1 %vm228_vm0, %v1212_v46 }
  0x79   : > { %1871 = vmatmul.mubr.msk.f32.gmra.mrb[14].mxu0 %vm228_vm0, %v2301_v10 }
  0x7a   : > { %1961 = vmatmul.mubr.msk.f32.gmra.mrb[14].mxu1 %vm228_vm0, %v1213_v47 }
 0x130   : > { %v1851_v49 = vpop.f32.mrb[0].mxu0 }
 0x131   : > { %v805_v50 = vadd.f32 %v1851_v49, %v2595_v48  ;;  %v1941_v51 = vpop.f32.mrb[0].mxu1  ;;  %v703_v52 = vpop.f32.mrb[1].mxu0 }
 0x132   : > { %v1424_v53 = vadd.f32 %v1941_v51, %v2595_v48  ;;  %v804_v54 = vadd.f32 %v2595_v48, %v703_v52  ;;  %v1328_v55 = vpop.f32.mrb[1].mxu1 }
 0x133   : > { %821 = vst [vmem:[%s2600_s9 + $0x8] sm:$0xff] %v805_v50  ;;  %v1423_v56 = vadd.f32 %v2595_v48, %v1328_v55 }
 0x134   : > { %1440 = vst [vmem:[%s2600_s9 + $0x88] sm:$0xff] %v1424_v53  ;;  %820 = vst [vmem:[%s2600_s9] sm:$0xff] %v804_v54  ;;  %v1854_v57 = vpop.f32.mrb[2].mxu0 }
 0x135   : > { %1439 = vst [vmem:[%s2600_s9 + $0x80] sm:$0xff] %v1423_v56  ;;  %v807_v58 = vadd.f32 %v1854_v57, %v2595_v48  ;;  %v1944_v59 = vpop.f32.mrb[2].mxu1  ;;  %v713_v60 = vpop.f32.mrb[3].mxu0 }
 0x136   : > { %v1426_v61 = vadd.f32 %v1944_v59, %v2595_v48  ;;  %v806_v62 = vadd.f32 %v2595_v48, %v713_v60  ;;  %v1338_v63 = vpop.f32.mrb[3].mxu1 }
 0x137   : > { %823 = vst [vmem:[%s2600_s9 + $0x18] sm:$0xff] %v807_v58  ;;  %v1425_v0 = vadd.f32 %v2595_v48, %v1338_v63 }
 0x138   : > { %1442 = vst [vmem:[%s2600_s9 + $0x98] sm:$0xff] %v1426_v61  ;;  %822 = vst [vmem:[%s2600_s9 + $0x10] sm:$0xff] %v806_v62  ;;  %v1857_v1 = vpop.f32.mrb[4].mxu0 }
 0x139   : > { %1441 = vst [vmem:[%s2600_s9 + $0x90] sm:$0xff] %v1425_v0  ;;  %v809_v2 = vadd.f32 %v1857_v1, %v2595_v48  ;;  %v1947_v3 = vpop.f32.mrb[4].mxu1  ;;  %v723_v4 = vpop.f32.mrb[5].mxu0 }
 0x13a   : > { %v1428_v5 = vadd.f32 %v1947_v3, %v2595_v48  ;;  %v808_v6 = vadd.f32 %v2595_v48, %v723_v4  ;;  %v1348_v7 = vpop.f32.mrb[5].mxu1 }
 0x13b   : > { %825 = vst [vmem:[%s2600_s9 + $0x28] sm:$0xff] %v809_v2  ;;  %v1427_v8 = vadd.f32 %v2595_v48, %v1348_v7 }
 0x13c   : > { %1444 = vst [vmem:[%s2600_s9 + $0xa8] sm:$0xff] %v1428_v5  ;;  %824 = vst [vmem:[%s2600_s9 + $0x20] sm:$0xff] %v808_v6  ;;  %v1860_v9 = vpop.f32.mrb[6].mxu0 }
 0x13d   : > { %1443 = vst [vmem:[%s2600_s9 + $0xa0] sm:$0xff] %v1427_v8  ;;  %v811_v10 = vadd.f32 %v1860_v9, %v2595_v48  ;;  %v1950_v11 = vpop.f32.mrb[6].mxu1  ;;  %v733_v12 = vpop.f32.mrb[7].mxu0 }
 0x13e   : > { %v1430_v13 = vadd.f32 %v1950_v11, %v2595_v48  ;;  %v810_v14 = vadd.f32 %v2595_v48, %v733_v12  ;;  %v1358_v15 = vpop.f32.mrb[7].mxu1 }
 0x13f   : > { %827 = vst [vmem:[%s2600_s9 + $0x38] sm:$0xff] %v811_v10  ;;  %v1429_v16 = vadd.f32 %v2595_v48, %v1358_v15 }
 0x140   : > { %1446 = vst [vmem:[%s2600_s9 + $0xb8] sm:$0xff] %v1430_v13  ;;  %826 = vst [vmem:[%s2600_s9 + $0x30] sm:$0xff] %v810_v14  ;;  %v1863_v17 = vpop.f32.mrb[8].mxu0 }
 0x141   : > { %1445 = vst [vmem:[%s2600_s9 + $0xb0] sm:$0xff] %v1429_v16  ;;  %v813_v18 = vadd.f32 %v1863_v17, %v2595_v48  ;;  %v1953_v19 = vpop.f32.mrb[8].mxu1  ;;  %v743_v20 = vpop.f32.mrb[9].mxu0 }
 0x142   : > { %v1432_v21 = vadd.f32 %v1953_v19, %v2595_v48  ;;  %v812_v22 = vadd.f32 %v2595_v48, %v743_v20  ;;  %v1368_v23 = vpop.f32.mrb[9].mxu1 }
 0x143   : > { %829 = vst [vmem:[%s2600_s9 + $0x48] sm:$0xff] %v813_v18  ;;  %v1431_v24 = vadd.f32 %v2595_v48, %v1368_v23 }
 0x144   : > { %1448 = vst [vmem:[%s2600_s9 + $0xc8] sm:$0xff] %v1432_v21  ;;  %828 = vst [vmem:[%s2600_s9 + $0x40] sm:$0xff] %v812_v22  ;;  %v1866_v25 = vpop.f32.mrb[10].mxu0 }
 0x145   : > { %1447 = vst [vmem:[%s2600_s9 + $0xc0] sm:$0xff] %v1431_v24  ;;  %v815_v26 = vadd.f32 %v1866_v25, %v2595_v48  ;;  %v1956_v27 = vpop.f32.mrb[10].mxu1  ;;  %v753_v28 = vpop.f32.mrb[11].mxu0 }
 0x146   : > { %v1434_v29 = vadd.f32 %v1956_v27, %v2595_v48  ;;  %v814_v30 = vadd.f32 %v2595_v48, %v753_v28  ;;  %v1378_v31 = vpop.f32.mrb[11].mxu1 }
 0x147   : > { %831 = vst [vmem:[%s2600_s9 + $0x58] sm:$0xff] %v815_v26  ;;  %v1433_v32 = vadd.f32 %v2595_v48, %v1378_v31 }
 0x148   : > { %1450 = vst [vmem:[%s2600_s9 + $0xd8] sm:$0xff] %v1434_v29  ;;  %830 = vst [vmem:[%s2600_s9 + $0x50] sm:$0xff] %v814_v30  ;;  %v1869_v33 = vpop.f32.mrb[12].mxu0 }
 0x149   : > { %1449 = vst [vmem:[%s2600_s9 + $0xd0] sm:$0xff] %v1433_v32  ;;  %v817_v34 = vadd.f32 %v1869_v33, %v2595_v48  ;;  %v1959_v35 = vpop.f32.mrb[12].mxu1  ;;  %v763_v36 = vpop.f32.mrb[13].mxu0 }
 0x14a   : > { %v1436_v37 = vadd.f32 %v1959_v35, %v2595_v48  ;;  %v816_v38 = vadd.f32 %v2595_v48, %v763_v36  ;;  %v1388_v39 = vpop.f32.mrb[13].mxu1 }
 0x14b   : > { %833 = vst [vmem:[%s2600_s9 + $0x68] sm:$0xff] %v817_v34  ;;  %v1435_v40 = vadd.f32 %v2595_v48, %v1388_v39 }
 0x14c   : > { %1452 = vst [vmem:[%s2600_s9 + $0xe8] sm:$0xff] %v1436_v37  ;;  %832 = vst [vmem:[%s2600_s9 + $0x60] sm:$0xff] %v816_v38  ;;  %v1872_v41 = vpop.f32.mrb[14].mxu0 }
 0x14d   : > { %1451 = vst [vmem:[%s2600_s9 + $0xe0] sm:$0xff] %v1435_v40  ;;  %v819_v42 = vadd.f32 %v1872_v41, %v2595_v48  ;;  %v1962_v43 = vpop.f32.mrb[14].mxu1  ;;  %v773_v44 = vpop.f32.mrb[15].mxu0 }
 0x14e   : > { %v1438_v45 = vadd.f32 %v1962_v43, %v2595_v48  ;;  %v818_v46 = vadd.f32 %v2595_v48, %v773_v44  ;;  %v1398_v47 = vpop.f32.mrb[15].mxu1 }
 0x14f   : > { %835 = vst [vmem:[%s2600_s9 + $0x78] sm:$0xff] %v819_v42  ;;  %v1437_v49 = vadd.f32 %v2595_v48, %v1398_v47 }
 0x150   : > { %1454 = vst [vmem:[%s2600_s9 + $0xf8] sm:$0xff] %v1438_v45  ;;  %834 = vst [vmem:[%s2600_s9 + $0x70] sm:$0xff] %v818_v46 }
 0x151   : > { %1453 = vst [vmem:[%s2600_s9 + $0xf0] sm:$0xff] %v1437_v49 }
 0x152   : > { %2122 = shalt.err (!%p2119_p5)
}
 0x153   : > { %s2123_s29 = scalar_lea.hbm %s2663_s19, 4096  ;;  %s2127_s5 = scalar_lea.hbm %s2723_s3, 8192 }
 0x154   : > { %p2124_p6 = scmp.ne.s32.totalorder %s2663_s19, %s2123_s29  ;;  %p2128_p10 = scmp.lt.u32.totalorder %s2663_s19, %s2723_s3 }
 0x155   : > { %p2129_p11 = scmp.lt.u32.totalorder %s2127_s5, %s2123_s29  ;;  %p2131_p13 = scmp.lt.u32.totalorder %s2123_s29, %s2663_s19 }
 0x156   : > { %p2125_p7 = pnand %p2124_p6, %p2252_p4 }
 0x157   : > { %p2130_p12 = por %p2129_p11, %p2128_p10 }
 0x158   : > { %p2126_p9 = pneg %p2125_p7 }
 0x159   : > { %p2132_p0 = por %p2131_p13, %p2130_p12 }
 0x15b   : > { %p2133_p1 = pnand %p2132_p0, %p2126_p9 }
 0x15d   : > { %2136 = shalt.err (!%p2133_p1)
}
 0x15e   : > { %s2190_s8 = smov 128   ;;  %s2191_s9 = smov 8  }
 0x15f   : > { %2052 = dma.vmem_to_hbm [thread:$0]  (%p2252_p4), %s2665_s11, 4096, %s2663_s19, %s2674_s21, %s2190_s8, %s2190_s8, %s2191_s9  }
 0x160 PF: > { %p2058_p2 = scmp.ge.s32.totalorder %s2187_s17, 2  ;;  %s1486_s10 = sand.u32 1, %s2167_s12  }
 0x161   : > { %s1487_s15 = scalar_lea.sflag [#allocation3], %s1486_s10 }
 0x162   : > { %p2055_p3 = pnand %p2058_p2, %p2259_p8 }
 0x164   : > { %2162 = dma.done.wait (!%p2055_p3), %s1487_s15, 4096  }
 0x165   : > { %2164 = vsyncadd (!%p2055_p3), %s1487_s15, 4294963200  ;;  %s16_s17 = sadd.s32 1, %s2187_s17   ;;  %s2726_s12 = smov %s2171_s13 }
 0x166   : > { %p13_p5 = scmp.ge.s32.totalorder %s16_s17, 4   ;;  %s2727_s13 = smov %s2175_s14 }
 0x167   : > { %s2728_s14 = smov %s2265_s25  ;;  %s2729_s15 = smov %s2183_s16 }
 0x168   : > { %s2730_s16 = smov %s2732_s20  ;;  %15 = sbr.rel (!%p13_p5) target bundleno = 4 (0x4), region = 69 }
 0x16f   :  { %1492 = vsyncpa [#allocation3], 1 }
 0x170   :  { %1494 = vsyncpa [#allocation3 + $0x1], 1 }

</bundles_post_ra>
